<compile_context>
chip_gen: v7x
topology: tpu7x:2x2x1
jax: 0.10.0
libtpu: 0.0.40
codegen_flags: <defaults>
</compile_context>

<pallas_src>
import functools

import jax
import jax.numpy as jnp
import numpy as np
from jax.experimental import pallas as pl
from jax.experimental.pallas import tpu as pltpu


def _round_up(x: int, m: int) -> int:
    return ((x + m - 1) // m) * m


def _pick_row_tile(rows_al: int, tr_cap: int, sub: int) -> int:
    """Largest multiple of `sub` that divides rows_al and is <= tr_cap.

    Falls back to tr_cap (accepting row padding + one output copy) only when every
    divisor is so small that it would heavily serialize the grid.
    """
    tr_cap = max(sub, min(tr_cap, rows_al))
    q = rows_al // sub
    best = 1
    d = 1
    while d * d <= q:
        if q % d == 0:
            for cand in (d, q // d):
                if sub * cand <= tr_cap:
                    best = max(best, cand)
        d += 1
    tr = sub * best
    if tr * 4 < tr_cap:          # divisor tiles far smaller than the cap -> too many steps
        return tr_cap            # accept padding + final slice copy instead
    return tr


def _kpt_to_maps_kernel(grid_ref, kp_ref, out_ref, *, heatmap_width: float):
    # grid_ref: (8, L) f32 — row 0: g_row value at flat lane l (= linspace(-1,1,W)[l//W])
    #                        row 1: g_col value at flat lane l (= linspace(1,-1,W)[l% W])
    # kp_ref  : (TR, 4) f32 — [x, y, scale, sigma] per row (row = n*C + c)
    # out_ref : (TR, L) out_dtype
    kp = kp_ref[...]                       # (TR, 4)
    x = kp[:, 0:1]                         # (TR, 1)
    y = kp[:, 1:2]
    scale = kp[:, 2:3]
    sigma = kp[:, 3:4]

    # -1 / keypoint_width = -W^2 / (2*sigma^2): per-row column, sign pre-folded so no
    # per-element negate is needed.
    neg_inv_w = (-0.5 * heatmap_width * heatmap_width) / (sigma * sigma)   # (TR, 1)

    gx = grid_ref[0:1, :]                  # (1, L)
    gy = grid_ref[1:2, :]                  # (1, L)

    # (TR,1) row constants broadcast against (1,L) lane constants; Mosaic lowers these
    # as vreg broadcasts fused into the elementwise chain (only dx/dy/exponent are
    # full-width temporaries). exp(a)*exp(b) fused into one exp(a+b): one EUP
    # transcendental + a few VPU multiplies per output element.
    dx = gx - x                            # (TR, L)
    dy = gy - y
    out_ref[...] = (jnp.exp((dx * dx + dy * dy) * neg_inv_w) * scale).astype(out_ref.dtype)


@functools.partial(jax.jit, static_argnames=("heatmap_width", "out_dtype"))
def keypoints_to_feature_maps(keypoint_tensor: jax.Array,
                              heatmap_width: int = 16,
                              out_dtype=jnp.float32) -> jax.Array:
    """keypoint_tensor: (N, C, 4) float -> (N, C, W, W) of `out_dtype`."""
    N, C, K = keypoint_tensor.shape
    assert K == 4, "expected (N, C, 4): [x, y, scale, sigma]"
    W = int(heatmap_width)
    assert W >= 1
    WW = W * W
    WW_pad = _round_up(WW, 128)            # unmasked 128-lane stores for any W (W=16: no pad)
    rows = N * C

    out_itemsize = jnp.dtype(out_dtype).itemsize
    sub = 8 if out_itemsize >= 4 else 16   # sublane alignment of the output tile (f32/bf16)
    rows_al = _round_up(rows, sub)

    row_out_bytes = WW_pad * out_itemsize
    total_out_bytes = rows_al * row_out_bytes

    # ~4 MiB output block. Double-buffered, together with the lane-padded keypoint
    # block (tr x 128 lanes x 4 B = tr * 512 B per buffer), this stays well under the
    # 32 MiB scoped-VMEM limit set below on every generation (v7x physical = 64 MiB).
    tr_cap = max(sub, ((4 << 20) // row_out_bytes) // sub * sub)
    if total_out_bytes >= (2 << 20):
        # Large enough that v7x's two TensorCores each get >= 1 MiB of stores from a
        # 2-way split; on single-TC v5e/v6e the extra grid step (~0.35 us) is small
        # against >= 0.7 us of HBM stores. Small workloads stay as a single tile.
        tr_cap = min(tr_cap, max(sub, (rows_al // 2) // sub * sub))
    tr = _pick_row_tile(rows_al, tr_cap, sub)
    n_tiles = pl.cdiv(rows_al, tr)
    rows_padded = n_tiles * tr

    # Flattened pixel grids (trace-time constants under jit).
    lin_row = np.linspace(-1.0, 1.0, W, dtype=np.float32)   # axis-2 grid, indexed by l // W
    lin_col = np.linspace(1.0, -1.0, W, dtype=np.float32)   # axis-3 grid, indexed by l %  W
    grid_const = np.zeros((8, WW_pad), dtype=np.float32)    # padded to 8 sublanes
    grid_const[0, :WW] = np.repeat(lin_row, W)
    grid_const[1, :WW] = np.tile(lin_col, W)
    grid_const = jnp.asarray(grid_const)

    kp_flat = keypoint_tensor.reshape(rows, 4).astype(jnp.float32)
    if rows_padded > rows:
        # Pad with sigma = 1 (avoids 0/0 -> NaN in throwaway rows); sliced off below.
        pad = jnp.zeros((rows_padded - rows, 4), jnp.float32).at[:, 3].set(1.0)
        kp_flat = jnp.concatenate([kp_flat, pad], axis=0)

    kernel = functools.partial(_kpt_to_maps_kernel, heatmap_width=float(W))

    out_flat = pl.pallas_call(
        kernel,
        out_shape=jax.ShapeDtypeStruct((rows_padded, WW_pad), out_dtype),
        grid_spec=pltpu.PrefetchScalarGridSpec(
            num_scalar_prefetch=0,
            grid=(n_tiles,),
            in_specs=[
                pl.BlockSpec((8, WW_pad), lambda r: (0, 0)),    # constant pixel grids
                pl.BlockSpec((tr, 4), lambda r: (r, 0)),        # keypoint rows
            ],
            out_specs=pl.BlockSpec((tr, WW_pad), lambda r: (r, 0)),
        ),
        compiler_params=pltpu.CompilerParams(
            dimension_semantics=("parallel",),
            vmem_limit_bytes=32 * 1024 * 1024,
        ),
    )(grid_const, kp_flat)

    if rows_padded != rows or WW_pad != WW:
        # Only reached when padding was unavoidable (rows not sublane-aligned with no
        # reasonable divisor tile, or W*W not a multiple of 128); forces one copy.
        out_flat = out_flat[:rows, :WW]
    return out_flat.reshape(N, C, W, W)


def _reference(keypoint_tensor: np.ndarray, heatmap_width: int) -> np.ndarray:
    """Pure-numpy mirror of the PyTorch forward pass (for verification)."""
    kp = keypoint_tensor.astype(np.float32)
    N, C, _ = kp.shape
    W = heatmap_width
    x = kp[:, :, 0].reshape(N, C, 1, 1)
    y = kp[:, :, 1].reshape(N, C, 1, 1)
    scale = kp[:, :, 2].reshape(N, C, 1, 1)
    sigma = kp[:, :, 3].reshape(N, C, 1, 1)
    kp_w = 2.0 * np.square(sigma / W)                       # (N,C,1,1)
    g_row = np.linspace(-1.0, 1.0, W, dtype=np.float32).reshape(1, 1, W, 1)
    g_col = np.linspace(1.0, -1.0, W, dtype=np.float32).reshape(1, 1, 1, W)
    x_vec = np.exp(-np.square(g_row - x) / kp_w)            # (N,C,W,1)
    y_vec = np.exp(-np.square(g_col - y) / kp_w)            # (N,C,W,W)
    return x_vec * y_vec * scale                            # (N,C,W,W)


if __name__ == "__main__":
    N, C, W = 2, 4, 16
    key = jax.random.PRNGKey(0)
    k_xy, k_scale, k_sigma = jax.random.split(key, 3)
    coords = jax.random.uniform(k_xy, (N, C, 2), minval=-1.0, maxval=1.0)
    scales = jax.random.uniform(k_scale, (N, C, 1), minval=0.5, maxval=1.5)
    sigmas = jax.random.uniform(k_sigma, (N, C, 1), minval=1.0, maxval=3.0)
    keypoints = jnp.concatenate([coords, scales, sigmas], axis=2).astype(jnp.float32)

    out = keypoints_to_feature_maps(keypoints, heatmap_width=W)
    out = jax.block_until_ready(out)

    ref = _reference(np.asarray(keypoints), W)
    np.testing.assert_allclose(np.asarray(out), ref, rtol=1e-5, atol=1e-6)
    print("KERNEL_OK")
</pallas_src>

<mosaic_0001>
module attributes {stable_mosaic.version = 11 : i64} {
  func.func @_kpt_to_maps_kernel(%arg0: i32, %arg1: memref<8x256xf32, #tpu.memory_space<vmem>>, %arg2: memref<8x4xf32, #tpu.memory_space<vmem>>, %arg3: memref<8x256xf32, #tpu.memory_space<vmem>>) attributes {dimension_semantics = [#tpu.dimension_semantics<parallel>], iteration_bounds = array<i64: 1>, scalar_prefetch = 0 : i64, scratch_operands = 0 : i64, tpu.core_type = #tpu.core_type<tc>, window_params = [{pipeline_mode = #tpu.pipeline_mode<synchronous>, transform_indices = @transform_0, window_bounds = array<i64: 8, 256>}, {transform_indices = @transform_1, window_bounds = array<i64: 8, 4>}, {transform_indices = @transform_2, window_bounds = array<i64: 8, 256>}]} {
    %c0 = arith.constant 0 : index
    %c0_0 = arith.constant 0 : index
    %0 = vector.load %arg2[%c0, %c0_0] : memref<8x4xf32, #tpu.memory_space<vmem>>, vector<8x4xf32>
    %1 = vector.extract_strided_slice %0 {offsets = [0, 0], sizes = [8, 1], strides = [1, 1]} : vector<8x4xf32> to vector<8x1xf32>
    %2 = vector.extract_strided_slice %0 {offsets = [0, 1], sizes = [8, 1], strides = [1, 1]} : vector<8x4xf32> to vector<8x1xf32>
    %3 = vector.extract_strided_slice %0 {offsets = [0, 2], sizes = [8, 1], strides = [1, 1]} : vector<8x4xf32> to vector<8x1xf32>
    %4 = vector.extract_strided_slice %0 {offsets = [0, 3], sizes = [8, 1], strides = [1, 1]} : vector<8x4xf32> to vector<8x1xf32>
    %5 = arith.mulf %4, %4 : vector<8x1xf32>
    %cst = arith.constant -1.280000e+02 : f32
    %6 = vector.broadcast %cst : f32 to vector<8x1xf32>
    %7 = arith.divf %6, %5 : vector<8x1xf32>
    %c0_1 = arith.constant 0 : index
    %c0_2 = arith.constant 0 : index
    %8 = vector.load %arg1[%c0_1, %c0_2] : memref<8x256xf32, #tpu.memory_space<vmem>>, vector<1x256xf32>
    %c1 = arith.constant 1 : index
    %c0_3 = arith.constant 0 : index
    %9 = vector.load %arg1[%c1, %c0_3] : memref<8x256xf32, #tpu.memory_space<vmem>>, vector<1x256xf32>
    %10 = vector.broadcast %8 : vector<1x256xf32> to vector<8x256xf32>
    %11 = vector.broadcast %1 : vector<8x1xf32> to vector<8x256xf32>
    %12 = arith.subf %10, %11 : vector<8x256xf32>
    %13 = vector.broadcast %9 : vector<1x256xf32> to vector<8x256xf32>
    %14 = vector.broadcast %2 : vector<8x1xf32> to vector<8x256xf32>
    %15 = arith.subf %13, %14 : vector<8x256xf32>
    %16 = arith.mulf %12, %12 : vector<8x256xf32>
    %17 = arith.mulf %15, %15 : vector<8x256xf32>
    %18 = arith.addf %16, %17 : vector<8x256xf32>
    %19 = vector.broadcast %7 : vector<8x1xf32> to vector<8x256xf32>
    %20 = arith.mulf %18, %19 : vector<8x256xf32>
    %21 = math.exp %20 : vector<8x256xf32>
    %22 = vector.broadcast %3 : vector<8x1xf32> to vector<8x256xf32>
    %23 = arith.mulf %21, %22 : vector<8x256xf32>
    %c0_4 = arith.constant 0 : index
    %c0_5 = arith.constant 0 : index
    %24 = vector.load %arg3[%c0_4, %c0_5] : memref<8x256xf32, #tpu.memory_space<vmem>>, vector<8x256xf32>
    tpu.vector_store %arg3[%c0_4, %c0_5], %23 {strides = array<i32>} : memref<8x256xf32, #tpu.memory_space<vmem>>, vector<8x256xf32>,
    return
  }
  func.func @transform_0(%arg0: i32) -> (i32, i32) {
    %c0_i32 = arith.constant 0 : i32
    %c0_i32_0 = arith.constant 0 : i32
    %c0_i32_1 = arith.constant 0 : i32
    return %c0_i32, %c0_i32_0 : i32, i32
  }
  func.func @transform_1(%arg0: i32) -> (i32, i32) {
    %c0_i32 = arith.constant 0 : i32
    %c0_i32_0 = arith.constant 0 : i32
    return %arg0, %c0_i32 : i32, i32
  }
  func.func @transform_2(%arg0: i32) -> (i32, i32) {
    %c0_i32 = arith.constant 0 : i32
    %c0_i32_0 = arith.constant 0 : i32
    return %arg0, %c0_i32 : i32, i32
  }
}

</mosaic_0001>

<bundles_post_ra>
// kernel: keypoints_to_feature_maps.1
= control target key start
LH: loop header
LB: loop body
LE: loop exit
PB: predicated region body
PF: predicated region fallthrough
CT: control target
= control target key end

     0   :  { %7 = vsyncpa [#allocation3], 0  ;;  %s224_s0 = inlined_call_operand.hbm [shape: f32[8,256], index: 0, kind: input, shape index: {}]   ;;  %s225_s1 = inlined_call_operand.hbm [shape: f32[8,4], index: 1, kind: input, shape index: {}]   ;;  %s226_s2 = inlined_call_operand.vmem [shape: f32[8,256], index: 2, kind: output, shape index: {}]  }
   0x1   :  { %8 = vsyncpa [#allocation5], 0  ;;  %s173_s9 = smov [#allocation2]   ;;  %s174_s11 = smov [#allocation4]  }
   0x2   :  { %s15_s10 = sshll.u32 %s173_s9, 4  ;;  %s25_s12 = sshll.u32 %s174_s11, 4  ;;  %s16_s10 = int_to_ptr.vmem [resolvable:$true] %s15_s10  ;;  %s26_s12 = int_to_ptr.vmem [resolvable:$true] %s25_s12 }
   0x3   :  { %s125_s15 = scalar_lea.hbm %s224_s0, 256 }
   0x4   :  { %p126_p0 = scmp.ne.s32.totalorder %s224_s0, %s125_s15  ;;  %p129_p1 = scmp.lt.u32.totalorder %s125_s15, %s224_s0 }
   0x6   :  { %p131_p2 = pnand %p129_p1, %p126_p0 }
   0x8   :  { %134 = shalt.err (!%p131_p2)
}
   0x9   :  { %s135_s20 = scalar_lea.vmem %s16_s10, 256  ;;  %p140_p4 = scmp.lt.s32.totalorder %s16_s10, %s16_s10 }
   0xa   :  { %p136_p3 = scmp.ne.s32.totalorder %s16_s10, %s135_s20  ;;  %p141_p5 = scmp.lt.s32.totalorder %s135_s20, %s135_s20 }
   0xc   :  { %p142_p6 = por %p141_p5, %p140_p4 }
   0xe   :  { %p143_p7 = pnand %p142_p6, %p136_p3 }
  0x10   :  { %146 = shalt.err (!%p143_p7)
}
  0x11   :  { %18 = dma.hbm_to_vmem [thread:$0]  %s224_s0, 256, %s16_s10, [#allocation3]  }
  0x12   :  { %s147_s25 = scalar_lea.hbm %s225_s1, 128 }
  0x13   :  { %p148_p8 = scmp.ne.s32.totalorder %s225_s1, %s147_s25  ;;  %p151_p9 = scmp.lt.u32.totalorder %s147_s25, %s225_s1 }
  0x15   :  { %p153_p10 = pnand %p151_p9, %p148_p8 }
  0x17   :  { %156 = shalt.err (!%p153_p10)
}
  0x18   :  { %s157_s30 = scalar_lea.vmem %s26_s12, 128  ;;  %p162_p12 = scmp.lt.s32.totalorder %s26_s12, %s26_s12 }
  0x19   :  { %p158_p11 = scmp.ne.s32.totalorder %s26_s12, %s157_s30  ;;  %p163_p13 = scmp.lt.s32.totalorder %s157_s30, %s157_s30 }
  0x1b   :  { %p164_p0 = por %p163_p13, %p162_p12 }
  0x1d   :  { %p165_p1 = pnand %p164_p0, %p158_p11 }
  0x1f   :  { %168 = shalt.err (!%p165_p1)
}
  0x20   :  { %28 = dma.hbm_to_vmem [thread:$0]  %s225_s1, 128, %s26_s12, [#allocation5]  }
  0x21   :  { %169 = dma.done.wait [#allocation3], 256  }
  0x22   :  { %170 = vsyncadd [#allocation3], 4294967040 }
  0x23   :  { %171 = dma.done.wait [#allocation5], 128  }
  0x24   :  { %172 = vsyncadd [#allocation5], 4294967168  ;;  %v175_v0 = vmov 0   ;;  %v176_v1 = vmov 3   ;;  %v35_v2 = vld [vmem:[#allocation4] sm:$0xff]  ;;  %v177_v4 = vmov 1   ;;  %v43_v8 = vlaneseq }
  0x25   :  { %114 = vset.pattern.permute.xlu0 %v175_v0  ;;  %116 = vset.pattern.permute.xlu1 %v176_v1  ;;  %v36_v3 = vmul.f32 %v35_v2, %v35_v2  ;;  %v178_v5 = vmov 2   ;;  %v39_v12 = vld [vmem:[#allocation2] ss:$8 sm:$0x3] }
  0x26   :  { %55 = vperm.xlu0 %114, %v35_v2   ;;  %v44_v9 = vshrl.u32 %v43_v8, 7  ;;  %v41_v13 = vld [vmem:[#allocation2 + $0x1] ss:$8 sm:$0x3] }
  0x27   :  { %119 = vrcp.f32 %v36_v3 }
  0x28   :  { %v45_v10 = vsub.s32 0, %v44_v9  ;;  %v49_v11 = vsub.s32 1, %v44_v9 }
  0x2a   :  { %115 = vset.pattern.permute.xlu0 %v177_v4  ;;  %v46_v15 = vrot.slane %v39_v12, %v45_v10  ;;  %v50_v16 = vrot.slane %v39_v12, %v49_v11  ;;  %v64_v17 = vrot.slane %v41_v13, %v45_v10  ;;  %v68_v18 = vrot.slane %v41_v13, %v49_v11 }
  0x2b   :  { %72 = vperm.xlu0 %115, %v35_v2  }
  0x2f   :  { %118 = vset.pattern.permute.xlu0 %v178_v5 }
  0x31   :  { %v120_v6 = vpop.eup %119 }
  0x32   :  { %v38_v7 = vmul.f32 -128.0, %v120_v6 }
  0x34   :  { %85 = vperm.xlu1 %116, %v38_v7  }
  0x38   :  { %117 = vset.pattern.permute.xlu1 %v178_v5 }
  0x39   :  { %95 = vperm.xlu1 %117, %v35_v2  }
  0xa5   :  { %v56_v14 = vpop.permute.xlu0 %55 }
  0xa6   :  { %v58_v20 = vsub.f32 %v46_v15, %v56_v14  ;;  %v59_v21 = vsub.f32 %v50_v16, %v56_v14 }
  0xa8   :  { %v77_v24 = vmul.f32 %v58_v20, %v58_v20  ;;  %v78_v25 = vmul.f32 %v59_v21, %v59_v21 }
  0xaa   :  { %v73_v19 = vpop.permute.xlu0 %72 }
  0xab   :  { %v75_v22 = vsub.f32 %v64_v17, %v73_v19  ;;  %v76_v23 = vsub.f32 %v68_v18, %v73_v19 }
  0xad   :  { %v79_v26 = vmul.f32 %v75_v22, %v75_v22  ;;  %v80_v27 = vmul.f32 %v76_v23, %v76_v23 }
  0xaf   :  { %v81_v28 = vadd.f32 %v79_v26, %v77_v24  ;;  %v82_v29 = vadd.f32 %v80_v27, %v78_v25 }
  0xb3   :  { %v86_v30 = vpop.permute.xlu1 %85 }
  0xb4   :  { %v88_v31 = vmul.f32 %v86_v30, %v81_v28  ;;  %v89_v32 = vmul.f32 %v86_v30, %v82_v29 }
  0xb6   :  { %v90_v33 = vmul.f32 1.442695, %v88_v31  ;;  %v92_v34 = vmul.f32 1.442695, %v89_v32 }
  0xb8   :  { %121 = vpow2.f32 %v90_v33  ;;  %v96_v35 = vpop.permute.xlu1 %95 }
  0xb9   :  { %123 = vpow2.f32 %v92_v34 }
  0xc2   :  { %v122_v36 = vpop.eup %121 }
  0xc3   :  { %v124_v37 = vpop.eup %123  ;;  %v98_v38 = vmul.f32 %v122_v36, %v96_v35 }
  0xc4   :  { %v99_v39 = vmul.f32 %v124_v37, %v96_v35 }
  0xc5   :  { %100 = vst [vmem:[%s226_s2] sm:$0xff] %v98_v38 }
  0xc6   :  { %101 = vst [vmem:[%s226_s2 + $0x8] sm:$0xff] %v99_v39 }
  0xc7   :  { %106 = vsyncpa [#allocation3], 1 }
  0xc8   :  { %107 = vsyncpa [#allocation5], 1 }

</bundles_post_ra>
